<compile_context>
chip_gen: v7x
topology: tpu7x:2x2x1
jax: 0.10.0
libtpu: 0.0.40
codegen_flags: <defaults>
</compile_context>

<pallas_src>
import functools

import jax
import jax.numpy as jnp
from jax import lax
from jax.experimental import pallas as pl
from jax.experimental.pallas import tpu as pltpu


# Tap order (dh, dw) for the 3x3 stencil; must match the fused-weight stacking below.
_TAPS = tuple((dh, dw) for dh in (-1, 0, 1) for dw in (-1, 0, 1))


def _dwpw_kernel(x_ref, top_ref, bot_ref, col_ref, wf_ref, bf_ref, o_ref, *, width):
    # x_ref  : (1, C, Ls)      strip of R rows, spatial flattened (Ls = R*W), lane-dense
    # top_ref: (1, 1, C, W+1)  [zero corner col | row above strip]   (zeros at image top)
    # bot_ref: (1, 1, C, W+1)  [row below strip | zero corner col]   (zeros at image bottom)
    # col_ref: (1, Ls)         column index (p mod W) of each flattened position (int32)
    # wf_ref : (9, Cout, C)    fused per-tap weights: wf[t] = wpw * wdw[:, tap_t]
    # bf_ref : (Cout, 1)       fused bias: wpw @ b_dw   (f32)
    # o_ref  : (1, Cout, Ls)   lane-dense output tile
    C, Ls = x_ref.shape[1], x_ref.shape[2]
    Cout = o_ref.shape[1]
    W = width
    P = W + 1  # halo (1 row + 1 corner column) on each side of the flattened strip

    # Single load of the strip + halos; everything below is value (vreg) work.
    x = x_ref[0]            # (C, Ls)
    top = top_ref[0, 0]     # (C, W+1)
    bot = bot_ref[0, 0]     # (C, W+1)

    # Padded slab as a value: [corner0 | row above | strip | row below | corner0].
    xs = jnp.concatenate([top, x, bot], axis=1)   # (C, Ls + 2*(W+1))

    # W-boundary masks (a horizontal shift in the flat layout would otherwise wrap to
    # the neighbouring row).  col is precomputed in the wrapper -> no integer '%' here.
    col = col_ref[...]               # (1, Ls)
    m_left = col > 0                 # neighbour at w-1 exists
    m_right = col < (W - 1)          # neighbour at w+1 exists

    # Fused depthwise + pointwise: 9 MXU matmuls (Cout, C) @ (C, Ls), one f32
    # accumulator initialised with the fused bias (saves a separate bias pass).
    acc = jnp.broadcast_to(bf_ref[...], (Cout, Ls)).astype(jnp.float32)
    for t, (dh, dw) in enumerate(_TAPS):
        off = P + dh * W + dw
        xt = lax.slice_in_dim(xs, off, off + Ls, axis=1)   # shifted window, (C, Ls)
        if dw == -1:
            xt = jnp.where(m_left, xt, 0)
        elif dw == 1:
            xt = jnp.where(m_right, xt, 0)
        acc = acc + jnp.dot(wf_ref[t], xt, preferred_element_type=jnp.float32)

    o_ref[0] = acc.astype(o_ref.dtype)


def _choose_rows_per_strip(H, W, C, Cout, itemsize, *,
                           target_lanes=8192, vmem_budget=12 << 20):
    """Pick R (rows per strip): R | H, R*W a multiple of 128 when possible, and the
    double-buffered in/out blocks kept well under the v7x / default scoped-VMEM budget."""
    bytes_per_lane = 2 * (C + Cout) * itemsize + 2 * 4   # 2x in + 2x out blocks + col ids
    candidates = [r for r in range(1, H + 1)
                  if H % r == 0 and ((r * W) % 128 == 0 or r == H)]
    fitting = [r for r in candidates if r * W * bytes_per_lane <= vmem_budget]
    pool = fitting or [min(candidates)]
    under = [r for r in pool if r * W <= target_lanes]
    return max(under) if under else min(pool)


def depthwise_conv_pallas(x_nchw, w_dw, b_dw, w_pw, *, rows_per_strip=None):
    """x_nchw: (N, C, H, W); w_dw: (C, 1, 3, 3); b_dw: (C,); w_pw: (Cout, C, 1, 1)."""
    N, C, H, W = x_nchw.shape
    Cout = w_pw.shape[0]
    L = H * W
    dt = x_nchw.dtype
    itemsize = jnp.dtype(dt).itemsize

    if rows_per_strip is None:
        rows_per_strip = _choose_rows_per_strip(H, W, C, Cout, itemsize)
    R = rows_per_strip
    assert H % R == 0, "rows_per_strip must divide H"
    S = H // R
    Ls = R * W

    # Row-major flatten of the spatial dims; keeps the NCHW channel-major layout
    # (no NCHW<->NHWC transpose and no full spatial zero-pad pass over HBM).
    x_flat = x_nchw.reshape(N, C, L)

    # 1-row halos per strip (rows s*R-1 and s*R+R, zero rows at the image borders),
    # with the slab corner zero column folded onto the outer side.  These side arrays
    # are ~2/R of the input (tiny) and let every block stay auto-pipelined
    # (no manual DMA, no per-step VMEM->VMEM staging copy).
    zrow = jnp.zeros((N, C, 1, W), dt)
    zcol = jnp.zeros((N, C, S, 1), dt)
    if S > 1:
        above = jnp.concatenate([zrow, x_nchw[:, :, R - 1:H - 1:R, :]], axis=2)  # (N,C,S,W)
        below = jnp.concatenate([x_nchw[:, :, R:H:R, :], zrow], axis=2)          # (N,C,S,W)
    else:
        above = zrow
        below = zrow
    tops = jnp.concatenate([zcol, above], axis=3).transpose(0, 2, 1, 3)   # (N,S,C,W+1)
    bots = jnp.concatenate([below, zcol], axis=3).transpose(0, 2, 1, 3)   # (N,S,C,W+1)

    # Per-lane column index (p mod W), precomputed so the kernel avoids integer '%'.
    col_ids = jnp.tile(jnp.arange(W, dtype=jnp.int32), H).reshape(1, L)

    # Weight-sized precompute (negligible): fold depthwise weights/bias into pointwise.
    wdw = w_dw[:, 0, :, :]                                    # (C, 3, 3)
    wpw = w_pw[:, :, 0, 0]                                    # (Cout, C)
    wf = jnp.stack(
        [wpw * wdw[:, dh + 1, dw + 1][None, :] for dh, dw in _TAPS], axis=0
    ).astype(dt)                                              # (9, Cout, C) MXU operands
    bf = (wpw.astype(jnp.float32) @ b_dw.astype(jnp.float32)).reshape(Cout, 1)  # f32

    kernel = functools.partial(_dwpw_kernel, width=W)
    out_flat = pl.pallas_call(
        kernel,
        out_shape=jax.ShapeDtypeStruct((N, Cout, L), dt),
        grid=(N, S),
        in_specs=[
            pl.BlockSpec((1, C, Ls), lambda n, s: (n, 0, s)),
            pl.BlockSpec((1, 1, C, W + 1), lambda n, s: (n, s, 0, 0)),
            pl.BlockSpec((1, 1, C, W + 1), lambda n, s: (n, s, 0, 0)),
            pl.BlockSpec((1, Ls), lambda n, s: (0, s)),
            pl.BlockSpec((9, Cout, C), lambda n, s: (0, 0, 0)),
            pl.BlockSpec((Cout, 1), lambda n, s: (0, 0)),
        ],
        out_specs=pl.BlockSpec((1, Cout, Ls), lambda n, s: (n, 0, s)),
        # Both axes independent -> shardable across both v7x TensorCores even at N=1.
        compiler_params=pltpu.CompilerParams(
            dimension_semantics=("parallel", "parallel")),
    )(x_flat, tops, bots, col_ids, wf, bf)

    return out_flat.reshape(N, Cout, H, W)


def _reference(x_nchw, w_dw, b_dw, w_pw):
    # Pure-JAX reference (NCHW, same as PyTorch conv semantics).
    C = x_nchw.shape[1]
    dw = lax.conv_general_dilated(
        x_nchw, w_dw, window_strides=(1, 1), padding=((1, 1), (1, 1)),
        dimension_numbers=("NCHW", "OIHW", "NCHW"), feature_group_count=C)
    dw = dw + b_dw[None, :, None, None]
    pw = lax.conv_general_dilated(
        dw, w_pw, window_strides=(1, 1), padding=((0, 0), (0, 0)),
        dimension_numbers=("NCHW", "OIHW", "NCHW"))
    return pw


if __name__ == "__main__":
    key = jax.random.PRNGKey(0)
    k_x, k_dw, k_b, k_pw = jax.random.split(key, 4)

    N, in_ch, out_ch, H, W = 2, 4, 8, 16, 16

    x = jax.random.normal(k_x, (N, in_ch, H, W), dtype=jnp.float32)
    # Deterministic parameter init (shapes match nn.Conv2d in the module).
    w_dw = jax.random.normal(k_dw, (in_ch, 1, 3, 3), dtype=jnp.float32) * 0.2
    b_dw = jax.random.normal(k_b, (in_ch,), dtype=jnp.float32) * 0.1
    w_pw = jax.random.normal(k_pw, (out_ch, in_ch, 1, 1), dtype=jnp.float32) * 0.2

    ref = jax.block_until_ready(_reference(x, w_dw, b_dw, w_pw))

    # Multi-strip path: 2 strips of 8 rows -> exercises the real inter-strip halo rows.
    out_strips = jax.block_until_ready(
        depthwise_conv_pallas(x, w_dw, b_dw, w_pw, rows_per_strip=8))
    # Auto strip choice (one strip per image at this size -> zero halos on both sides).
    out_auto = jax.block_until_ready(depthwise_conv_pallas(x, w_dw, b_dw, w_pw))

    assert out_strips.shape == (N, out_ch, H, W)
    assert jnp.allclose(out_strips, ref, atol=1e-4, rtol=1e-4)
    assert jnp.allclose(out_auto, ref, atol=1e-4, rtol=1e-4)

    print("KERNEL_OK")
</pallas_src>

<mosaic_0001>
module attributes {stable_mosaic.version = 11 : i64} {
  func.func @_dwpw_kernel(%arg0: i32, %arg1: i32, %arg2: memref<1x4x128xf32, #tpu.memory_space<vmem>>, %arg3: memref<1x1x4x17xf32, #tpu.memory_space<vmem>>, %arg4: memref<1x1x4x17xf32, #tpu.memory_space<vmem>>, %arg5: memref<1x128xi32, #tpu.memory_space<vmem>>, %arg6: memref<9x8x4xf32, #tpu.memory_space<vmem>>, %arg7: memref<8x1xf32, #tpu.memory_space<vmem>>, %arg8: memref<1x8x128xf32, #tpu.memory_space<vmem>>) attributes {dimension_semantics = [#tpu.dimension_semantics<parallel>, #tpu.dimension_semantics<parallel>], iteration_bounds = array<i64: 2, 2>, scalar_prefetch = 0 : i64, scratch_operands = 0 : i64, tpu.core_type = #tpu.core_type<tc>, window_params = [{transform_indices = @transform_0, window_bounds = array<i64: 1, 4, 128>}, {transform_indices = @transform_1, window_bounds = array<i64: 1, 1, 4, 17>}, {transform_indices = @transform_2, window_bounds = array<i64: 1, 1, 4, 17>}, {transform_indices = @transform_3, window_bounds = array<i64: 1, 128>}, {pipeline_mode = #tpu.pipeline_mode<synchronous>, transform_indices = @transform_4, window_bounds = array<i64: 9, 8, 4>}, {pipeline_mode = #tpu.pipeline_mode<synchronous>, transform_indices = @transform_5, window_bounds = array<i64: 8, 1>}, {transform_indices = @transform_6, window_bounds = array<i64: 1, 8, 128>}]} {
    %c0 = arith.constant 0 : index
    %c0_0 = arith.constant 0 : index
    %c0_1 = arith.constant 0 : index
    %0 = vector.load %arg2[%c0, %c0_0, %c0_1] : memref<1x4x128xf32, #tpu.memory_space<vmem>>, vector<1x4x128xf32>
    %1 = vector.shape_cast %0 : vector<1x4x128xf32> to vector<4x128xf32>
    %c0_2 = arith.constant 0 : index
    %c0_3 = arith.constant 0 : index
    %c0_4 = arith.constant 0 : index
    %c0_5 = arith.constant 0 : index
    %2 = vector.load %arg3[%c0_2, %c0_3, %c0_4, %c0_5] : memref<1x1x4x17xf32, #tpu.memory_space<vmem>>, vector<1x1x4x17xf32>
    %3 = vector.shape_cast %2 : vector<1x1x4x17xf32> to vector<4x17xf32>
    %c0_6 = arith.constant 0 : index
    %c0_7 = arith.constant 0 : index
    %c0_8 = arith.constant 0 : index
    %c0_9 = arith.constant 0 : index
    %4 = vector.load %arg4[%c0_6, %c0_7, %c0_8, %c0_9] : memref<1x1x4x17xf32, #tpu.memory_space<vmem>>, vector<1x1x4x17xf32>
    %5 = vector.shape_cast %4 : vector<1x1x4x17xf32> to vector<4x17xf32>
    %6 = tpu.concatenate %3, %1, %5 in 1 : vector<4x17xf32>, vector<4x128xf32>, vector<4x17xf32> -> vector<4x162xf32>
    %c0_10 = arith.constant 0 : index
    %c0_11 = arith.constant 0 : index
    %7 = vector.load %arg5[%c0_10, %c0_11] : memref<1x128xi32, #tpu.memory_space<vmem>>, vector<1x128xi32>
    %c0_i32 = arith.constant 0 : i32
    %8 = vector.broadcast %c0_i32 : i32 to vector<1x128xi32>
    %9 = arith.cmpi sgt, %7, %8 : vector<1x128xi32>
    %c15_i32 = arith.constant 15 : i32
    %10 = vector.broadcast %c15_i32 : i32 to vector<1x128xi32>
    %11 = arith.cmpi slt, %7, %10 : vector<1x128xi32>
    %c0_12 = arith.constant 0 : index
    %c0_13 = arith.constant 0 : index
    %12 = vector.load %arg7[%c0_12, %c0_13] : memref<8x1xf32, #tpu.memory_space<vmem>>, vector<8x1xf32>
    %13 = vector.shape_cast %12 : vector<8x1xf32> to vector<8x1xf32>
    %14 = vector.broadcast %13 : vector<8x1xf32> to vector<8x128xf32>
    %15 = vector.extract_strided_slice %6 {offsets = [0, 0], sizes = [4, 128], strides = [1, 1]} : vector<4x162xf32> to vector<4x128xf32>
    %c0_i32_14 = arith.constant 0 : i32
    %16 = arith.sitofp %c0_i32_14 : i32 to f32
    %17 = vector.shape_cast %9 : vector<1x128xi1> to vector<1x128xi1>
    %18 = vector.broadcast %17 : vector<1x128xi1> to vector<4x128xi1>
    %19 = vector.broadcast %16 : f32 to vector<4x128xf32>
    %20 = arith.select %18, %15, %19 : vector<4x128xi1>, vector<4x128xf32>
    %c0_15 = arith.constant 0 : index
    %c0_16 = arith.constant 0 : index
    %c0_17 = arith.constant 0 : index
    %21 = vector.load %arg6[%c0_15, %c0_16, %c0_17] : memref<9x8x4xf32, #tpu.memory_space<vmem>>, vector<1x8x4xf32>
    %22 = vector.shape_cast %21 : vector<1x8x4xf32> to vector<8x4xf32>
    %cst = arith.constant dense<0.000000e+00> : vector<8x128xf32>
    %23 = tpu.matmul %22, %20, %cst {dimension_numbers = #tpu.dot_dimension_numbers<[1], [0], [0], [1], [0, 0, 1, 1], [], []>} : vector<8x4xf32>, vector<4x128xf32>, vector<8x128xf32> -> vector<8x128xf32>
    %24 = arith.addf %14, %23 : vector<8x128xf32>
    %25 = vector.extract_strided_slice %6 {offsets = [0, 1], sizes = [4, 128], strides = [1, 1]} : vector<4x162xf32> to vector<4x128xf32>
    %c1 = arith.constant 1 : index
    %c0_18 = arith.constant 0 : index
    %c0_19 = arith.constant 0 : index
    %26 = vector.load %arg6[%c1, %c0_18, %c0_19] : memref<9x8x4xf32, #tpu.memory_space<vmem>>, vector<1x8x4xf32>
    %27 = vector.shape_cast %26 : vector<1x8x4xf32> to vector<8x4xf32>
    %cst_20 = arith.constant dense<0.000000e+00> : vector<8x128xf32>
    %28 = tpu.matmul %27, %25, %cst_20 {dimension_numbers = #tpu.dot_dimension_numbers<[1], [0], [0], [1], [0, 0, 1, 1], [], []>} : vector<8x4xf32>, vector<4x128xf32>, vector<8x128xf32> -> vector<8x128xf32>
    %29 = arith.addf %24, %28 : vector<8x128xf32>
    %30 = vector.extract_strided_slice %6 {offsets = [0, 2], sizes = [4, 128], strides = [1, 1]} : vector<4x162xf32> to vector<4x128xf32>
    %c0_i32_21 = arith.constant 0 : i32
    %31 = arith.sitofp %c0_i32_21 : i32 to f32
    %32 = vector.shape_cast %11 : vector<1x128xi1> to vector<1x128xi1>
    %33 = vector.broadcast %32 : vector<1x128xi1> to vector<4x128xi1>
    %34 = vector.broadcast %31 : f32 to vector<4x128xf32>
    %35 = arith.select %33, %30, %34 : vector<4x128xi1>, vector<4x128xf32>
    %c2 = arith.constant 2 : index
    %c0_22 = arith.constant 0 : index
    %c0_23 = arith.constant 0 : index
    %36 = vector.load %arg6[%c2, %c0_22, %c0_23] : memref<9x8x4xf32, #tpu.memory_space<vmem>>, vector<1x8x4xf32>
    %37 = vector.shape_cast %36 : vector<1x8x4xf32> to vector<8x4xf32>
    %cst_24 = arith.constant dense<0.000000e+00> : vector<8x128xf32>
    %38 = tpu.matmul %37, %35, %cst_24 {dimension_numbers = #tpu.dot_dimension_numbers<[1], [0], [0], [1], [0, 0, 1, 1], [], []>} : vector<8x4xf32>, vector<4x128xf32>, vector<8x128xf32> -> vector<8x128xf32>
    %39 = arith.addf %29, %38 : vector<8x128xf32>
    %40 = vector.extract_strided_slice %6 {offsets = [0, 16], sizes = [4, 128], strides = [1, 1]} : vector<4x162xf32> to vector<4x128xf32>
    %c0_i32_25 = arith.constant 0 : i32
    %41 = arith.sitofp %c0_i32_25 : i32 to f32
    %42 = vector.shape_cast %9 : vector<1x128xi1> to vector<1x128xi1>
    %43 = vector.broadcast %42 : vector<1x128xi1> to vector<4x128xi1>
    %44 = vector.broadcast %41 : f32 to vector<4x128xf32>
    %45 = arith.select %43, %40, %44 : vector<4x128xi1>, vector<4x128xf32>
    %c3 = arith.constant 3 : index
    %c0_26 = arith.constant 0 : index
    %c0_27 = arith.constant 0 : index
    %46 = vector.load %arg6[%c3, %c0_26, %c0_27] : memref<9x8x4xf32, #tpu.memory_space<vmem>>, vector<1x8x4xf32>
    %47 = vector.shape_cast %46 : vector<1x8x4xf32> to vector<8x4xf32>
    %cst_28 = arith.constant dense<0.000000e+00> : vector<8x128xf32>
    %48 = tpu.matmul %47, %45, %cst_28 {dimension_numbers = #tpu.dot_dimension_numbers<[1], [0], [0], [1], [0, 0, 1, 1], [], []>} : vector<8x4xf32>, vector<4x128xf32>, vector<8x128xf32> -> vector<8x128xf32>
    %49 = arith.addf %39, %48 : vector<8x128xf32>
    %50 = vector.extract_strided_slice %6 {offsets = [0, 17], sizes = [4, 128], strides = [1, 1]} : vector<4x162xf32> to vector<4x128xf32>
    %c4 = arith.constant 4 : index
    %c0_29 = arith.constant 0 : index
    %c0_30 = arith.constant 0 : index
    %51 = vector.load %arg6[%c4, %c0_29, %c0_30] : memref<9x8x4xf32, #tpu.memory_space<vmem>>, vector<1x8x4xf32>
    %52 = vector.shape_cast %51 : vector<1x8x4xf32> to vector<8x4xf32>
    %cst_31 = arith.constant dense<0.000000e+00> : vector<8x128xf32>
    %53 = tpu.matmul %52, %50, %cst_31 {dimension_numbers = #tpu.dot_dimension_numbers<[1], [0], [0], [1], [0, 0, 1, 1], [], []>} : vector<8x4xf32>, vector<4x128xf32>, vector<8x128xf32> -> vector<8x128xf32>
    %54 = arith.addf %49, %53 : vector<8x128xf32>
    %55 = vector.extract_strided_slice %6 {offsets = [0, 18], sizes = [4, 128], strides = [1, 1]} : vector<4x162xf32> to vector<4x128xf32>
    %c0_i32_32 = arith.constant 0 : i32
    %56 = arith.sitofp %c0_i32_32 : i32 to f32
    %57 = vector.shape_cast %11 : vector<1x128xi1> to vector<1x128xi1>
    %58 = vector.broadcast %57 : vector<1x128xi1> to vector<4x128xi1>
    %59 = vector.broadcast %56 : f32 to vector<4x128xf32>
    %60 = arith.select %58, %55, %59 : vector<4x128xi1>, vector<4x128xf32>
    %c5 = arith.constant 5 : index
    %c0_33 = arith.constant 0 : index
    %c0_34 = arith.constant 0 : index
    %61 = vector.load %arg6[%c5, %c0_33, %c0_34] : memref<9x8x4xf32, #tpu.memory_space<vmem>>, vector<1x8x4xf32>
    %62 = vector.shape_cast %61 : vector<1x8x4xf32> to vector<8x4xf32>
    %cst_35 = arith.constant dense<0.000000e+00> : vector<8x128xf32>
    %63 = tpu.matmul %62, %60, %cst_35 {dimension_numbers = #tpu.dot_dimension_numbers<[1], [0], [0], [1], [0, 0, 1, 1], [], []>} : vector<8x4xf32>, vector<4x128xf32>, vector<8x128xf32> -> vector<8x128xf32>
    %64 = arith.addf %54, %63 : vector<8x128xf32>
    %65 = vector.extract_strided_slice %6 {offsets = [0, 32], sizes = [4, 128], strides = [1, 1]} : vector<4x162xf32> to vector<4x128xf32>
    %c0_i32_36 = arith.constant 0 : i32
    %66 = arith.sitofp %c0_i32_36 : i32 to f32
    %67 = vector.shape_cast %9 : vector<1x128xi1> to vector<1x128xi1>
    %68 = vector.broadcast %67 : vector<1x128xi1> to vector<4x128xi1>
    %69 = vector.broadcast %66 : f32 to vector<4x128xf32>
    %70 = arith.select %68, %65, %69 : vector<4x128xi1>, vector<4x128xf32>
    %c6 = arith.constant 6 : index
    %c0_37 = arith.constant 0 : index
    %c0_38 = arith.constant 0 : index
    %71 = vector.load %arg6[%c6, %c0_37, %c0_38] : memref<9x8x4xf32, #tpu.memory_space<vmem>>, vector<1x8x4xf32>
    %72 = vector.shape_cast %71 : vector<1x8x4xf32> to vector<8x4xf32>
    %cst_39 = arith.constant dense<0.000000e+00> : vector<8x128xf32>
    %73 = tpu.matmul %72, %70, %cst_39 {dimension_numbers = #tpu.dot_dimension_numbers<[1], [0], [0], [1], [0, 0, 1, 1], [], []>} : vector<8x4xf32>, vector<4x128xf32>, vector<8x128xf32> -> vector<8x128xf32>
    %74 = arith.addf %64, %73 : vector<8x128xf32>
    %75 = vector.extract_strided_slice %6 {offsets = [0, 33], sizes = [4, 128], strides = [1, 1]} : vector<4x162xf32> to vector<4x128xf32>
    %c7 = arith.constant 7 : index
    %c0_40 = arith.constant 0 : index
    %c0_41 = arith.constant 0 : index
    %76 = vector.load %arg6[%c7, %c0_40, %c0_41] : memref<9x8x4xf32, #tpu.memory_space<vmem>>, vector<1x8x4xf32>
    %77 = vector.shape_cast %76 : vector<1x8x4xf32> to vector<8x4xf32>
    %cst_42 = arith.constant dense<0.000000e+00> : vector<8x128xf32>
    %78 = tpu.matmul %77, %75, %cst_42 {dimension_numbers = #tpu.dot_dimension_numbers<[1], [0], [0], [1], [0, 0, 1, 1], [], []>} : vector<8x4xf32>, vector<4x128xf32>, vector<8x128xf32> -> vector<8x128xf32>
    %79 = arith.addf %74, %78 : vector<8x128xf32>
    %80 = vector.extract_strided_slice %6 {offsets = [0, 34], sizes = [4, 128], strides = [1, 1]} : vector<4x162xf32> to vector<4x128xf32>
    %c0_i32_43 = arith.constant 0 : i32
    %81 = arith.sitofp %c0_i32_43 : i32 to f32
    %82 = vector.shape_cast %11 : vector<1x128xi1> to vector<1x128xi1>
    %83 = vector.broadcast %82 : vector<1x128xi1> to vector<4x128xi1>
    %84 = vector.broadcast %81 : f32 to vector<4x128xf32>
    %85 = arith.select %83, %80, %84 : vector<4x128xi1>, vector<4x128xf32>
    %c8 = arith.constant 8 : index
    %c0_44 = arith.constant 0 : index
    %c0_45 = arith.constant 0 : index
    %86 = vector.load %arg6[%c8, %c0_44, %c0_45] : memref<9x8x4xf32, #tpu.memory_space<vmem>>, vector<1x8x4xf32>
    %87 = vector.shape_cast %86 : vector<1x8x4xf32> to vector<8x4xf32>
    %cst_46 = arith.constant dense<0.000000e+00> : vector<8x128xf32>
    %88 = tpu.matmul %87, %85, %cst_46 {dimension_numbers = #tpu.dot_dimension_numbers<[1], [0], [0], [1], [0, 0, 1, 1], [], []>} : vector<8x4xf32>, vector<4x128xf32>, vector<8x128xf32> -> vector<8x128xf32>
    %89 = arith.addf %79, %88 : vector<8x128xf32>
    %c0_47 = arith.constant 0 : index
    %c0_48 = arith.constant 0 : index
    %c0_49 = arith.constant 0 : index
    %90 = vector.load %arg8[%c0_47, %c0_48, %c0_49] : memref<1x8x128xf32, #tpu.memory_space<vmem>>, vector<1x8x128xf32>
    %91 = vector.shape_cast %90 : vector<1x8x128xf32> to vector<8x128xf32>
    %92 = vector.shape_cast %89 : vector<8x128xf32> to vector<1x8x128xf32>
    tpu.vector_store %arg8[%c0_47, %c0_48, %c0_49], %92 {strides = array<i32>} : memref<1x8x128xf32, #tpu.memory_space<vmem>>, vector<1x8x128xf32>,
    return
  }
  func.func @transform_0(%arg0: i32, %arg1: i32) -> (i32, i32, i32) {
    %c0_i32 = arith.constant 0 : i32
    %c0_i32_0 = arith.constant 0 : i32
    return %arg0, %c0_i32, %arg1 : i32, i32, i32
  }
  func.func @transform_1(%arg0: i32, %arg1: i32) -> (i32, i32, i32, i32) {
    %c0_i32 = arith.constant 0 : i32
    %c0_i32_0 = arith.constant 0 : i32
    %c0_i32_1 = arith.constant 0 : i32
    return %arg0, %arg1, %c0_i32, %c0_i32_0 : i32, i32, i32, i32
  }
  func.func @transform_2(%arg0: i32, %arg1: i32) -> (i32, i32, i32, i32) {
    %c0_i32 = arith.constant 0 : i32
    %c0_i32_0 = arith.constant 0 : i32
    %c0_i32_1 = arith.constant 0 : i32
    return %arg0, %arg1, %c0_i32, %c0_i32_0 : i32, i32, i32, i32
  }
  func.func @transform_3(%arg0: i32, %arg1: i32) -> (i32, i32) {
    %c0_i32 = arith.constant 0 : i32
    %c0_i32_0 = arith.constant 0 : i32
    return %c0_i32, %arg1 : i32, i32
  }
  func.func @transform_4(%arg0: i32, %arg1: i32) -> (i32, i32, i32) {
    %c0_i32 = arith.constant 0 : i32
    %c0_i32_0 = arith.constant 0 : i32
    %c0_i32_1 = arith.constant 0 : i32
    %c0_i32_2 = arith.constant 0 : i32
    return %c0_i32, %c0_i32_0, %c0_i32_1 : i32, i32, i32
  }
  func.func @transform_5(%arg0: i32, %arg1: i32) -> (i32, i32) {
    %c0_i32 = arith.constant 0 : i32
    %c0_i32_0 = arith.constant 0 : i32
    %c0_i32_1 = arith.constant 0 : i32
    return %c0_i32, %c0_i32_0 : i32, i32
  }
  func.func @transform_6(%arg0: i32, %arg1: i32) -> (i32, i32, i32) {
    %c0_i32 = arith.constant 0 : i32
    %c0_i32_0 = arith.constant 0 : i32
    return %arg0, %c0_i32, %arg1 : i32, i32, i32
  }
}

</mosaic_0001>

<bundles_post_ra>
// kernel: tpu_custom_call.1
= control target key start
LH: loop header
LB: loop body
LE: loop exit
PB: predicated region body
PF: predicated region fallthrough
CT: control target
= control target key end

     0   :  { %11 = vsyncpa [#allocation3], 0  ;;  %s1890_s0 = inlined_call_operand.vmem [shape: f32[2,4,256], index: 0, kind: input, shape index: {}]   ;;  %s1891_s1 = inlined_call_operand.vmem [shape: f32[2,2,4,17], index: 1, kind: input, shape index: {}]   ;;  %s1892_s2 = inlined_call_operand.vmem [shape: f32[2,2,4,17], index: 2, kind: input, shape index: {}]   ;;  %s1893_s3 = inlined_call_operand.vmem [shape: s32[1,256], index: 3, kind: input, shape index: {}]   ;;  %s1894_s4 = inlined_call_operand.vmem [shape: f32[9,8,4], index: 4, kind: input, shape index: {}]   ;;  %s1895_s5 = inlined_call_operand.vmem [shape: f32[8,1], index: 5, kind: input, shape index: {}]   ;;  %s1896_s6 = inlined_call_operand.hbm [shape: f32[2,8,256], index: 6, kind: output, shape index: {}]  }
   0x1   :  { %13 = vsyncpa [#allocation3 + $0x1], 0  ;;  %s1646_s21 = smov 0   ;;  %s1648_s22 = smov 0  }
   0x2   :  { %s1650_s23 = smov 0   ;;  %s1652_s24 = smov 0  }
   0x3   :  { %s1654_s25 = smov 0   ;;  %s1656_s26 = smov 0  }
   0x4   :  { %s1658_s27 = smov 0   ;;  %s1660_s28 = smov 0  }
   0x5 LB: > { %1901 = sst [smem:[#allocation5_spill]] %s1588_s26  ;;  %s1296_s29 = sadd.s32 4294967295, %s1596_s28   ;;  %s1596_s28 = sphi %s1660_s28, %s19_s28   ;;  %s1592_s27 = sphi %s1658_s27, %s1910_s27   ;;  %s1588_s26 = sphi %s1656_s26, %s1909_s26   ;;  %s1584_s25 = sphi %s1654_s25, %s1908_s25   ;;  %s1580_s24 = sphi %s1652_s24, %s1907_s24   ;;  %s1576_s23 = sphi %s1650_s23, %s1913_s23   ;;  %s1572_s22 = sphi %s1648_s22, %s1912_s22   ;;  %s1568_s21 = sphi %s1646_s21, %s1911_s21  }
   0x6   : > { %1902 = sst [smem:[#allocation6_spill]] %s1592_s27  ;;  %s1297_s30 = sadd.s32 4294967294, %s1596_s28  }
   0x7   : > { %s28_s7 = sadd.s32 1, %s1588_s26  ;;  %s31_s8 = sadd.s32 1, %s1592_s27 }
   0x8   : > { %p29_p0 = scmp.ge.s32.totalorder %s28_s7, 2  ;;  %p202_p1 = scmp.ne.s32.totalorder %s1576_s23, %s1572_s22 }
   0x9   : > { %p203_p2 = scmp.eq.s32.totalorder %s1296_s29, 3  ;;  %p208_p5 = scmp.ne.s32.totalorder %s1572_s22, %s1568_s21 }
   0xa   : > { %s1915_s7 = smov (%p29_p0, %s28_s7), 0  ;;  %s1917_s8 = smov (!%p29_p0, %s31_s8), %s1592_s27 }
   0xb   : > { %1903 = sst [smem:[#allocation7_spill]] %s1915_s7  ;;  %s188_s9 = ssub.s32 %s1588_s26, %s1915_s7 }
   0xc   : > { %p1697_p3 = por %p203_p2, %p202_p1  ;;  %p33_p4 = scmp.ge.s32.totalorder %s1917_s8, 2 }
   0xd   : > { %p209_p6 = scmp.eq.s32.totalorder %s1297_s30, 3  ;;  %p1300_p7 = scmp.ge.s32.totalorder %s1596_s28, 1 }
   0xe   : > { %s1919_s8 = smov (%p33_p4, %s1917_s8), 0  ;;  %p272_p9 = scmp.lt.s32.totalorder %s1596_s28, 5 }
   0xf   : > { %1905 = sst [smem:[#allocation8_spill]] %s1919_s8  ;;  %p1706_p8 = por %p209_p6, %p208_p5 }
  0x10   : > { %s187_s12 = ssub.s32 %s1592_s27, %s1919_s8  ;;  %s192_s13 = sadd.s32 1, %s1576_s23 }
  0x11   : > { %s189_s14 = sor.u32 %s188_s9, %s187_s12  ;;  %p273_p10 = pnand %p1300_p7, %p272_p9 }
  0x12   : > { %p190_p11 = scmp.eq.s32.totalorder %s189_s14, 0  ;;  %p324_p12 = scmp.lt.s32.totalorder (!%p273_p10), %s1584_s25, 1  ;;  %v1598_v0 = vmov (!%p273_p10), 0.0   ;;  %v1599_v1 = vmov (!%p273_p10), 0   ;;  %v375_v4 = vlaneseq (!%p273_p10)  ;;  %vm1601_vm1 = vmmov (!%p273_p10), 0   ;;  %v381_v13 = vld [vmem:[%s1894_s4] sm:$0xff] (!%p273_p10) }
  0x13   : > { %276 = sbr.rel (%p273_p10) target bundleno = 530 (0x212), region = 44  ;;  %p326_p13 = scmp.lt.s32.totalorder (!%p273_p10), %s1580_s24, 1  ;;  %1357 = vmatprep.subr.mxu1 (!%p273_p10), %v1598_v0  ;;  %1377 = vmatprep.subr.mxu0 (!%p273_p10), %v1598_v0  ;;  %vm362_vm2 = vcmask (!%p273_p10), 138240   ;;  %vm386_vm4 = vcmask (!%p273_p10), 1043456   ;;  %vm382_vm5 = vcmask (!%p273_p10), 31744   ;;  %v368_v17 = vld [vmem:[%s1895_s5] sm:$0xff] (!%p273_p10) }
  0x14   : > { %s1715_s15 = scalar_select %p190_p11, %s1576_s23, %s192_s13  }
  0x15   : > { %1501 = vset.pattern.permute.xlu0 (!%p273_p10), %v1599_v1  ;;  %s1600_s8 = smov (!%p273_p10), 17   ;;  %v376_v6 = vshrl.u32 (!%p273_p10), %v375_v4, 7  ;;  %1379 = vmatprep.mubr.msk.f32.mxu0 (!%p273_p10), %vm1601_vm1, %v1598_v0  ;;  %s1602_s7 = smov (!%p273_p10), 110   ;;  %vm733_vm7 = vcmask (!%p273_p10), 908288   ;;  %v1319_v24 = vld [vmem:[%s1894_s4 + $0x20] sm:$0xff] (!%p273_p10)  ;;  %vm815_vm8 = vcmask (!%p273_p10), 900096  }
  0x16   : > { %1359 = vmatprep.mubr.msk.f32.mxu1 (!%p273_p10), %vm1601_vm1, %v1598_v0  ;;  %s1606_s29 = smov (!%p273_p10), 126   ;;  %s1607_s30 = smov (!%p273_p10), 95   ;;  %vm469_vm10 = vcmask (!%p273_p10), 1039360   ;;  %v1322_v31 = vld [vmem:[%s1894_s4 + $0x28] sm:$0xff] (!%p273_p10)  ;;  %vm902_vm11 = vcmask (!%p273_p10), 785408   ;;  %vm557_vm12 = vcmask (!%p273_p10), 1031168  }
  0x17   : > { %v377_v7 = vsub.s32 (!%p273_p10), 0, %v376_v6  ;;  %s1609_s12 = smov (!%p273_p10), 94   ;;  %v1310_v32 = vld [vmem:[%s1894_s4 + $0x8] sm:$0xff] (!%p273_p10)  ;;  %v1325_v40 = vld [vmem:[%s1894_s4 + $0x30] sm:$0xff] (!%p273_p10)  ;;  %vm991_vm13 = vcmask (!%p273_p10), 777216   ;;  %vm644_vm14 = vcmask (!%p273_p10), 916480  }
  0x18   : > { %v1313_v42 = vld [vmem:[%s1894_s4 + $0x10] sm:$0xff] (!%p273_p10)  ;;  %v1328_v48 = vld [vmem:[%s1894_s4 + $0x38] sm:$0xff] (!%p273_p10)  ;;  %vm1073_vm15 = vcmask (!%p273_p10), 769024   ;;  %v1331_v56 = vld [vmem:[%s1894_s4 + $0x40] sm:$0xff] (!%p273_p10) }
  0x19   : > { %v1316_v50 = vld [vmem:[%s1894_s4 + $0x18] sm:$0xff] (!%p273_p10) }
  0x1a   : > { %s325_s16 = scalar_select %p324_p12, %s1584_s25, 1 }
  0x1b   : > { %s327_s17 = scalar_select %p326_p13, %s1580_s24, 1 }
  0x1c   : > { %s1302_s18 = sshll.u32 %s325_s16, 1 }
  0x1d   : > { %s329_s19 = sadd.s32 %s1302_s18, %s327_s17  ;;  %s350_s26 = scalar_lea.vmem %s1893_s3, %s327_s17 }
  0x1e   : > { %s1303_s20 = sshll.u32 %s329_s19, 2  ;;  %v365_v5 = vld [vmem:[%s350_s26] sm:$0x1]  ;;  %s1603_s17 = smov 111  }
  0x1f   : > { %s331_s9 = scalar_lea.vmem %s1890_s0, %s1303_s20  ;;  %s347_s14 = scalar_lea.vmem %s1892_s2, %s1303_s20  ;;  %vm366_vm0 = vcmp.gt.s32.totalorder %v365_v5, 0  ;;  %vm367_vm6 = vcmp.lt.s32.totalorder %v365_v5, 15 }
  0x20   : > { %v351_v2 = vld [vmem:[%s331_s9] sm:$0xf]  ;;  %v374_v8 = vsel %vm366_vm0, 1, %v1599_v1  ;;  %s339_s18 = scalar_lea.vmem %s1891_s1, %s1303_s20  ;;  %s1604_s19 = smov 127   ;;  %v547_v20 = vsel %vm367_vm6, 1, %v1599_v1 }
  0x21   : > { %355 = vrot.lane.b32.xlu0 %v351_v2, %s1600_s8  ;;  %v353_v3 = vld [vmem:[%s347_s14] sm:$0xf]  ;;  %v1741_v9 = vrot.slane %v374_v8, %v377_v7  ;;  %s1605_s20 = smov 96   ;;  %s1608_s9 = smov 112   ;;  %v1760_v21 = vrot.slane %v547_v20, %v377_v7 }
  0x22   : > { %v352_v10 = vld [vmem:[%s339_s18] sm:$0xf]  ;;  %s1335_s26 = sshll.u32 %s1584_s25, 1 }
  0x23   : > { %vm379_vm3 = vcmp.eq.s32.totalorder %v1741_v9, 1  ;;  %vm552_vm9 = vcmp.eq.s32.totalorder %v1760_v21, 1  ;;  %s1169_s27 = sadd.s32 %s1580_s24, %s1335_s26 }
  0x25   : > { %359 = vrot.lane.b32.xlu0 %v353_v3, %s1600_s8  ;;  %s321_s8 = sand.u32 1, %s1572_s22  }
  0x26   : > { %s1301_s18 = sshll.u32 %s321_s8, 3  ;;  %s1158_s24 = scalar_lea.sflag [#allocation3], %s321_s8 }
  0x93   : > { %v356_v11 = vpop.permute.xlu0 %355 }
  0x94   : > { %v363_v12 = vsel %vm362_vm2, %v352_v10, %v356_v11 }
  0x95   : > { %811 = vrot.lane.b32.xlu0 %v363_v12, %s1602_s7  ;;  %729 = vrot.lane.b32.xlu1 %v363_v12, %s1603_s17  ;;  %v380_v14 = vsel %vm379_vm3, %v363_v12, 0.0 }
  0x96   : > { %1358 = vmatpush3.msk.msra.mxu1 %vm386_vm4, %v380_v14 }
  0x97   : > { %v360_v15 = vpop.permute.xlu0 %359  ;;  %1360 = vmatmul.mubr.msk.f32.vlgmr.msra.gmra.mrb[0].mxu1 %vm382_vm5, %v381_v13  ;;  %1362 = vmatprep.subr.mxu1 %v1598_v0 }
  0x98   : > { %v364_v16 = vsel %vm362_vm2, %v356_v11, %v360_v15  ;;  %1364 = vmatprep.mubr.msk.f32.mxu1 %vm1601_vm1, %v1598_v0 }
  0x99   : > { %465 = vrot.lane.b32.xlu0 %v363_v12, %s1604_s19  ;;  %731 = vrot.lane.b32.xlu1 %v364_v16, %s1603_s17  ;;  %s323_s17 = scalar_lea.vmem [#allocation2], %s1301_s18 }
  0x9d   : > { %898 = vrot.lane.b32.xlu0 %v363_v12, %s1605_s20  ;;  %813 = vrot.lane.b32.xlu1 %v364_v16, %s1602_s7  ;;  %s1336_s7 = sshll.u32 %s1169_s27, 7 }
  0xa1   : > { %553 = vrot.lane.b32.xlu0 %v363_v12, %s1606_s29  ;;  %467 = vrot.lane.b32.xlu1 %v364_v16, %s1604_s19  ;;  %s1173_s19 = sshll.u32 %s323_s17, 4  ;;  %s1839_s19 = int_to_ptr.vmem [resolvable:$true] %s1173_s19 }
  0xa2   : > { %s1502_s25 = scalar_lea.vmem %s1839_s19, 128 }
  0xa3   : > { %p1503_p0 = scmp.ne.s32.totalorder %s1839_s19, %s1502_s25 }
  0xa5   : > { %987 = vrot.lane.b32.xlu0 %v363_v12, %s1607_s30  ;;  %900 = vrot.lane.b32.xlu1 %v364_v16, %s1605_s20  ;;  %p1504_p1 = pnand %p1503_p0, %p1697_p3 }
  0xa7   : > { %p1505_p2 = pneg %p1504_p1 }
  0xa9   : > { %640 = vrot.lane.b32.xlu0 %v363_v12, %s1608_s9  ;;  %555 = vrot.lane.b32.xlu1 %v364_v16, %s1606_s29 }
  0xad   : > { %1069 = vrot.lane.b32.xlu0 %v363_v12, %s1609_s12  ;;  %989 = vrot.lane.b32.xlu1 %v364_v16, %s1607_s30  ;;  %s1837_s30 = scalar_lea.hbm %s1896_s6, %s1336_s7 }
  0xb1   : > { %642 = vrot.lane.b32.xlu1 %v364_v16, %s1608_s9  ;;  %371 = vperm.xlu0 %1501, %v368_v17   ;;  %s1610_s9 = smov [#allocation2]  }
  0xb5   : > { %1071 = vrot.lane.b32.xlu1 %v364_v16, %s1609_s12  ;;  %s1506_s12 = sshll.u32 %s1610_s9, 4  ;;  %s1507_s12 = int_to_ptr.vmem [resolvable:$false] %s1506_s12 }
  0xb6   : > { %s1508_s13 = scalar_lea.vmem %s1507_s12, 256  ;;  %p1509_p4 = scmp.lt.s32.totalorder %s1839_s19, %s1507_s12 }
  0xb7   : > { %p1510_p5 = scmp.lt.s32.totalorder %s1508_s13, %s1502_s25 }
  0xb9   : > { %p1511_p6 = por %p1510_p5, %p1509_p4 }
  0xbb   : > { %p1512_p7 = pnand %p1511_p6, %p1505_p2 }
 0x107   : > { %v730_v18 = vpop.permute.xlu1 %729  ;;  %v812_v19 = vpop.permute.xlu0 %811 }
 0x10b   : > { %v732_v22 = vpop.permute.xlu1 %731  ;;  %v466_v23 = vpop.permute.xlu0 %465 }
 0x10c   : > { %v734_v25 = vsel %vm733_vm7, %v730_v18, %v732_v22 }
 0x10d   : > { %1378 = vmatpush3.msk.msra.mxu0 %vm386_vm4, %v734_v25 }
 0x10e   : > { %1380 = vmatmul.mubr.msk.f32.vlgmr.msra.gmra.mrb[0].mxu0 %vm382_vm5, %v1319_v24  ;;  %1382 = vmatprep.subr.mxu0 %v1598_v0 }
 0x10f   : > { %v814_v26 = vpop.permute.xlu1 %813  ;;  %v899_v27 = vpop.permute.xlu0 %898  ;;  %1384 = vmatprep.mubr.msk.f32.mxu0 %vm1601_vm1, %v1598_v0 }
 0x110   : > { %v816_v28 = vsel %vm815_vm8, %v812_v19, %v814_v26 }
 0x111   : > { %v818_v29 = vsel %vm552_vm9, %v816_v28, 0.0 }
 0x112   : > { %1383 = vmatpush3.msk.msra.mxu0 %vm386_vm4, %v818_v29 }
 0x113   : > { %v468_v30 = vpop.permute.xlu1 %467  ;;  %1387 = vmatprep.subr.mxu0 %v1598_v0  ;;  %v554_v34 = vpop.permute.xlu0 %553 }
 0x114   : > { %v470_v33 = vsel %vm469_vm10, %v466_v23, %v468_v30 }
 0x115   : > { %1363 = vmatpush3.msk.msra.mxu1 %vm386_vm4, %v470_v33 }
 0x116   : > { %1385 = vmatmul.mubr.msk.f32.vlgmr.msra.gmra.mrb[0].mxu0 %vm382_vm5, %v1322_v31  ;;  %1365 = vmatmul.mubr.msk.f32.vlgmr.msra.gmra.mrb[0].mxu1 %vm382_vm5, %v1310_v32 }
 0x117   : > { %v901_v35 = vpop.permute.xlu1 %900  ;;  %1367 = vmatprep.subr.mxu1 %v1598_v0  ;;  %1389 = vmatprep.mubr.msk.f32.mxu0 %vm1601_vm1, %v1598_v0  ;;  %v988_v38 = vpop.permute.xlu0 %987 }
 0x118   : > { %v903_v36 = vsel %vm902_vm11, %v899_v27, %v901_v35  ;;  %1369 = vmatprep.mubr.msk.f32.mxu1 %vm1601_vm1, %v1598_v0 }
 0x119   : > { %v905_v37 = vsel %vm379_vm3, %v903_v36, 0.0 }
 0x11a   : > { %1388 = vmatpush3.msk.msra.mxu0 %vm386_vm4, %v905_v37 }
 0x11b   : > { %v556_v39 = vpop.permute.xlu1 %555  ;;  %1392 = vmatprep.subr.mxu0 %v1598_v0  ;;  %v641_v46 = vpop.permute.xlu0 %640 }
 0x11c   : > { %v558_v41 = vsel %vm557_vm12, %v554_v34, %v556_v39 }
 0x11d   : > { %v560_v43 = vsel %vm552_vm9, %v558_v41, 0.0 }
 0x11e   : > { %1368 = vmatpush3.msk.msra.mxu1 %vm386_vm4, %v560_v43  ;;  %1390 = vmatmul.mubr.msk.f32.vlgmr.msra.gmra.mrb[0].mxu0 %vm382_vm5, %v1325_v40 }
 0x11f   : > { %v990_v44 = vpop.permute.xlu1 %989  ;;  %1370 = vmatmul.mubr.msk.f32.vlgmr.msra.gmra.mrb[0].mxu1 %vm382_vm5, %v1313_v42  ;;  %1372 = vmatprep.subr.mxu1 %v1598_v0  ;;  %v1070_v52 = vpop.permute.xlu0 %1069 }
 0x120   : > { %v992_v45 = vsel %vm991_vm13, %v988_v38, %v990_v44  ;;  %1394 = vmatprep.mubr.msk.f32.mxu0 %vm1601_vm1, %v1598_v0  ;;  %1374 = vmatprep.mubr.msk.f32.mxu1 %vm1601_vm1, %v1598_v0 }
 0x121   : > { %1393 = vmatpush3.msk.msra.mxu0 %vm386_vm4, %v992_v45 }
 0x122   : > { %1397 = vmatprep.subr.mxu0 %v1598_v0 }
 0x123   : > { %v643_v47 = vpop.permute.xlu1 %642 }
 0x124   : > { %v645_v49 = vsel %vm644_vm14, %v641_v46, %v643_v47 }
 0x125   : > { %v647_v51 = vsel %vm379_vm3, %v645_v49, 0.0 }
 0x126   : > { %1373 = vmatpush3.msk.msra.mxu1 %vm386_vm4, %v647_v51  ;;  %1395 = vmatmul.mubr.msk.f32.vlgmr.msra.gmra.mrb[0].mxu0 %vm382_vm5, %v1328_v48 }
 0x127   : > { %v1072_v53 = vpop.permute.xlu1 %1071  ;;  %1375 = vmatmul.mubr.msk.f32.vlgmr.msra.gmra.mrb[0].mxu1 %vm382_vm5, %v1316_v50  ;;  %1399 = vmatprep.mubr.msk.f32.mxu0 %vm1601_vm1, %v1598_v0 }
 0x128   : > { %v1074_v54 = vsel %vm1073_vm15, %v1070_v52, %v1072_v53 }
 0x129   : > { %v1076_v55 = vsel %vm552_vm9, %v1074_v54, 0.0 }
 0x12a   : > { %1398 = vmatpush3.msk.msra.mxu0 %vm386_vm4, %v1076_v55 }
 0x12e   : > { %1400 = vmatmul.mubr.msk.f32.vlgmr.msra.gmra.mrb[0].mxu0 %vm382_vm5, %v1331_v56 }
 0x130   : > { %v372_v59 = vpop.permute.xlu0 %371 }
 0x1fa   : > { %v722_v57 = vpop.f32.mrb[0].mxu1 }
 0x1fb   : > { %v1376_v58 = vpop.f32.mrb[1].mxu1  ;;  %v1402_v60 = vadd.f32 %v722_v57, %v372_v59 }
 0x201   : > { %v1151_v61 = vpop.f32.mrb[0].mxu0 }
 0x202   : > { %v1403_v62 = vadd.f32 %v1402_v60, %v1151_v61  ;;  %v1401_v63 = vpop.f32.mrb[1].mxu0 }
 0x204   : > { %1156 = vst [vmem:[%s323_s17] sm:$0xff] %v1403_v62 }
 0x205   : > { %1515 = shalt.err (!%p1512_p7)
}
 0x206   : > { %s1516_s14 = scalar_lea.hbm %s1837_s30, 128  ;;  %s1520_s18 = scalar_lea.hbm %s1896_s6, 512 }
 0x207   : > { %p1517_p9 = scmp.ne.s32.totalorder %s1837_s30, %s1516_s14  ;;  %p1521_p12 = scmp.lt.u32.totalorder %s1837_s30, %s1896_s6 }
 0x208   : > { %p1522_p13 = scmp.lt.u32.totalorder %s1520_s18, %s1516_s14  ;;  %p1524_p1 = scmp.lt.u32.totalorder %s1516_s14, %s1837_s30 }
 0x209   : > { %p1518_p10 = pnand %p1517_p9, %p1697_p3 }
 0x20a   : > { %p1523_p0 = por %p1522_p13, %p1521_p12 }
 0x20b   : > { %p1519_p11 = pneg %p1518_p10 }
 0x20c   : > { %p1525_p2 = por %p1524_p1, %p1523_p0 }
 0x20e   : > { %p1526_p4 = pnand %p1525_p2, %p1519_p11 }
 0x210   : > { %1529 = shalt.err (!%p1526_p4)
}
 0x211   : > { %1418 = dma.vmem_to_hbm [thread:$0]  (%p1697_p3), %s1839_s19, 128, %s1837_s30, %s1158_s24  }
 0x212 PF: > { %p1424_p5 = scmp.ge.s32.totalorder %s1596_s28, 2  ;;  %s1185_s7 = sand.u32 1, %s1568_s21  }
 0x213   : > { %s1186_s17 = scalar_lea.sflag [#allocation3], %s1185_s7 }
 0x214   : > { %p1421_p6 = pnand %p1424_p5, %p1706_p8 }
 0x216   : > { %1563 = dma.done.wait (!%p1421_p6), %s1186_s17, 128  }
 0x217   : > { %1565 = vsyncadd (!%p1421_p6), %s1186_s17, 4294967168  ;;  %s19_s28 = sadd.s32 1, %s1596_s28   ;;  %s1907_s24 = sld [smem:[#allocation5_spill]] }
 0x218   : > { %p16_p7 = scmp.ge.s32.totalorder %s19_s28, 6   ;;  %s1908_s25 = sld [smem:[#allocation6_spill]] }
 0x219   : > { %s1909_s26 = sld [smem:[#allocation7_spill]]  ;;  %s1910_s27 = sld [smem:[#allocation8_spill]] }
 0x21a   : > { %s1911_s21 = smov %s1572_s22  ;;  %s1912_s22 = smov %s1576_s23 }
 0x21b   : > { %s1913_s23 = smov %s1715_s15  ;;  %18 = sbr.rel (!%p16_p7) target bundleno = 5 (0x5), region = 96 }
 0x222   :  { %1191 = vsyncpa [#allocation3], 1 }
 0x223   :  { %1193 = vsyncpa [#allocation3 + $0x1], 1 }

</bundles_post_ra>
